<compile_context>
chip_gen: v7x
topology: tpu7x:2x2x1
jax: 0.10.0
libtpu: 0.0.40
codegen_flags: <defaults>
</compile_context>

<pallas_src>
import jax
import jax.numpy as jnp
from jax.experimental import pallas as pl
from jax.experimental.pallas import tpu as pltpu


def _ir_score_kernel(q_mask_ref, q_emb_ref, d_mask_ref, d_emb_ref, out_ref,
                     qv_ref, acc_ref):
    k = pl.program_id(1)

    @pl.when(k == 0)
    def _():
        # Pool the query once per batch block on the MXU:
        # bf16 (tb,1,Lq) x (tb,Lq,D) -> f32 (tb,1,D), batched over tb.
        qv_ref[...] = jnp.einsum(
            "bql,bld->bqd", q_mask_ref[...], q_emb_ref[...],
            preferred_element_type=jnp.float32)
        acc_ref[...] = jnp.zeros_like(acc_ref)

    # Pool this document tile on the MXU (bf16 operands, f32 accumulation).
    dv = jnp.einsum(
        "bql,bld->bqd", d_mask_ref[...], d_emb_ref[...],
        preferred_element_type=jnp.float32)                 # (tb, 1, D) f32

    # Per-pair dot over D -> partial scores (tb, 1, 1); accumulate over Ld tiles.
    acc_ref[...] += jnp.einsum(
        "bqd,bkd->bqk", qv_ref[...], dv,
        preferred_element_type=jnp.float32)                 # (tb, 1, 1)

    @pl.when(k == pl.num_programs(1) - 1)
    def _():
        out_ref[...] = acc_ref[...].astype(out_ref.dtype)


def _choose_tiles(B, Lq, Ld, D):
    """VMEM-budgeted (batch block, Ld tile) selection + padded extents."""
    budget = 24 * 1024 * 1024   # working-set target; headroom under v7x's 64 MiB

    def footprint(tb, t_ld):
        emb = tb * (Lq + t_ld) * D * 2        # bf16 q/d embedding blocks
        msk = tb * (Lq + t_ld) * 2            # bf16 mask rows
        scr = tb * D * 4 + tb * 4             # f32 pooled-query + score scratch
        return 2 * (emb + msk) + scr          # x2: double-buffered input pipeline

    # >=2 batch blocks whenever possible so the "parallel" axis feeds the
    # pipeline / both v7x TensorCores; never one giant full-extent block.
    if B <= 128:
        tb = -(-B // 2) if B > 1 else 1
    else:
        tb = 128

    # Ld-tiling accumulator axis: shrink the doc tile (multiples of 128 lanes).
    t_ld = Ld
    while footprint(tb, t_ld) > budget and t_ld > 128:
        t_ld = max(128, ((t_ld // 2) + 127) // 128 * 128)
    # Still over budget: shrink the batch block.
    while footprint(tb, t_ld) > budget and tb > 8:
        tb = max(8, tb // 2)
    # Grow the batch block while it fits and >=2 blocks remain (amortizes the
    # ~0.35us per-grid-step overhead on v6e without losing the megacore split).
    while B > tb and footprint(tb * 2, t_ld) <= budget and -(-B // (tb * 2)) >= 2:
        tb *= 2

    B_pad = -(-B // tb) * tb
    Ld_pad = -(-Ld // t_ld) * t_ld
    return tb, t_ld, B_pad, Ld_pad, footprint(tb, t_ld)


def neural_ir_encoder_with_ids(embedding_table, query_tokens, doc_tokens):
    """embedding_table: [V, D] f32; query_tokens: [B, Lq] int32; doc_tokens: [B, Ld] int32.
    Returns per-pair relevance score [B] f32."""
    B, Lq = query_tokens.shape
    _, Ld = doc_tokens.shape
    _, D = embedding_table.shape

    # bf16 table BEFORE the gather (halves gather read bytes); mirrors fp16 autocast.
    # TODO(synk): fuse this gather into the kernel to avoid the HBM round-trip.
    table_bf16 = embedding_table.astype(jnp.bfloat16)
    q_emb = table_bf16[query_tokens]                        # [B, Lq, D] bf16
    d_emb = table_bf16[doc_tokens]                          # [B, Ld, D] bf16

    # Lane-dense bf16 masks, consumed directly as the LHS of the MXU pooling.
    q_mask = (query_tokens > 0).astype(jnp.bfloat16).reshape(B, 1, Lq)
    d_mask = (doc_tokens > 0).astype(jnp.bfloat16).reshape(B, 1, Ld)

    tb, t_ld, B_pad, Ld_pad, fp_bytes = _choose_tiles(B, Lq, Ld, D)

    # Zero-pad the tails: padded rows / positions have zero masks -> zero scores.
    if B_pad != B:
        bp = B_pad - B
        q_emb = jnp.pad(q_emb, ((0, bp), (0, 0), (0, 0)))
        d_emb = jnp.pad(d_emb, ((0, bp), (0, 0), (0, 0)))
        q_mask = jnp.pad(q_mask, ((0, bp), (0, 0), (0, 0)))
        d_mask = jnp.pad(d_mask, ((0, bp), (0, 0), (0, 0)))
    if Ld_pad != Ld:
        lp = Ld_pad - Ld
        d_emb = jnp.pad(d_emb, ((0, 0), (0, lp), (0, 0)))
        d_mask = jnp.pad(d_mask, ((0, 0), (0, 0), (0, lp)))

    n_b = B_pad // tb
    n_k = Ld_pad // t_ld

    # Deeper pipelining on the streamed doc-embedding blocks when the Ld axis
    # is deep enough to benefit (cheap latency hiding for a mem-bound kernel).
    if n_k >= 3:
        d_emb_spec = pl.BlockSpec((tb, t_ld, D), lambda b, k: (b, k, 0),
                                  pipeline_mode=pl.Buffered(3))
    else:
        d_emb_spec = pl.BlockSpec((tb, t_ld, D), lambda b, k: (b, k, 0))

    # Raise the scoped VMEM limit only when the working set needs it
    # (defaults: 16 MiB v5e / 32 MiB v6e, v7x); small problems keep the default.
    cp_kwargs = dict(dimension_semantics=("parallel", "arbitrary"))
    if fp_bytes > 12 * 1024 * 1024:
        cp_kwargs["vmem_limit_bytes"] = 64 * 1024 * 1024
    compiler_params = pltpu.CompilerParams(**cp_kwargs)

    cost = pl.CostEstimate(
        flops=2 * B_pad * (Lq + Ld_pad) * D + 2 * B_pad * D * n_k,
        transcendentals=0,
        bytes_accessed=(B_pad * (Lq + Ld_pad) * D * 2      # bf16 embeddings
                        + B_pad * (Lq + Ld_pad) * 2        # bf16 masks
                        + B_pad * 4))                      # f32 scores

    out = pl.pallas_call(
        _ir_score_kernel,
        out_shape=jax.ShapeDtypeStruct((B_pad, 1, 1), jnp.float32),
        grid_spec=pltpu.PrefetchScalarGridSpec(
            num_scalar_prefetch=0,
            grid=(n_b, n_k),
            in_specs=[
                pl.BlockSpec((tb, 1, Lq), lambda b, k: (b, 0, 0)),   # q_mask
                pl.BlockSpec((tb, Lq, D), lambda b, k: (b, 0, 0)),   # q_emb (resident over k)
                pl.BlockSpec((tb, 1, t_ld), lambda b, k: (b, 0, k)), # d_mask tile
                d_emb_spec,                                          # d_emb tile
            ],
            out_specs=pl.BlockSpec((tb, 1, 1), lambda b, k: (b, 0, 0)),
            scratch_shapes=[
                pltpu.VMEM((tb, 1, D), jnp.float32),   # pooled query vectors
                pltpu.VMEM((tb, 1, 1), jnp.float32),   # running scores
            ],
        ),
        compiler_params=compiler_params,
        cost_estimate=cost,
    )(q_mask, q_emb, d_mask, d_emb)

    return out[:B, 0, 0]


def _reference(embedding_table, query_tokens, doc_tokens):
    table_bf16 = embedding_table.astype(jnp.bfloat16)
    q_emb = table_bf16[query_tokens].astype(jnp.float32)
    d_emb = table_bf16[doc_tokens].astype(jnp.float32)
    q_mask = (query_tokens > 0).astype(jnp.float32)
    d_mask = (doc_tokens > 0).astype(jnp.float32)
    s = jnp.einsum("bqd,bkd->bqk", q_emb, d_emb)
    s = s * q_mask[:, :, None] * d_mask[:, None, :]
    return jnp.sum(s, axis=(1, 2))


if __name__ == "__main__":
    B, Lq, Ld, D, V = 2, 8, 16, 32, 50

    key = jax.random.PRNGKey(0)
    k_emb, k_q, k_d = jax.random.split(key, 3)

    # deterministic synthetic embedding table (row 0 is the padding id)
    embedding_table = 0.02 * jax.random.normal(k_emb, (V, D), dtype=jnp.float32)

    # token ids with explicit padding zeros at the tail
    query_tokens = jax.random.randint(k_q, (B, Lq), 1, V, dtype=jnp.int32)
    query_tokens = query_tokens.at[:, 6:].set(0)
    doc_tokens = jax.random.randint(k_d, (B, Ld), 1, V, dtype=jnp.int32)
    doc_tokens = doc_tokens.at[:, 12:].set(0)

    scores = neural_ir_encoder_with_ids(embedding_table, query_tokens, doc_tokens)
    scores = jax.block_until_ready(scores)

    ref = _reference(embedding_table, query_tokens, doc_tokens)
    assert scores.shape == (B,)
    assert jnp.allclose(scores, ref, rtol=2e-2, atol=2e-2)

    print("KERNEL_OK")
</pallas_src>

<mosaic_0001>
module attributes {stable_mosaic.version = 11 : i64} {
  func.func @_ir_score_kernel(%arg0: i32, %arg1: i32, %arg2: memref<1x1x8xbf16, #tpu.memory_space<vmem>>, %arg3: memref<1x8x32xbf16, #tpu.memory_space<vmem>>, %arg4: memref<1x1x16xbf16, #tpu.memory_space<vmem>>, %arg5: memref<1x16x32xbf16, #tpu.memory_space<vmem>>, %arg6: memref<1x1x1xf32, #tpu.memory_space<vmem>>, %arg7: memref<1x1x32xf32, #tpu.memory_space<vmem>>, %arg8: memref<1x1x1xf32, #tpu.memory_space<vmem>>) attributes {dimension_semantics = [#tpu.dimension_semantics<parallel>, #tpu.dimension_semantics<arbitrary>], iteration_bounds = array<i64: 2, 1>, scalar_prefetch = 0 : i64, scratch_operands = 2 : i64, tpu.core_type = #tpu.core_type<tc>, window_params = [{transform_indices = @transform_0, window_bounds = array<i64: 1, 1, 8>}, {transform_indices = @transform_1, window_bounds = array<i64: 1, 8, 32>}, {transform_indices = @transform_2, window_bounds = array<i64: 1, 1, 16>}, {transform_indices = @transform_3, window_bounds = array<i64: 1, 16, 32>}, {transform_indices = @transform_4, window_bounds = array<i64: 1, 1, 1>}]} {
    %c0_i32 = arith.constant 0 : i32
    %0 = arith.cmpi eq, %arg1, %c0_i32 : i32
    %1 = arith.extui %0 : i1 to i32
    %c0_i32_0 = arith.constant 0 : i32
    %2 = arith.cmpi ne, %1, %c0_i32_0 : i32
    scf.if %2 {
      %c0_18 = arith.constant 0 : index
      %c0_19 = arith.constant 0 : index
      %c0_20 = arith.constant 0 : index
      %14 = vector.load %arg2[%c0_18, %c0_19, %c0_20] : memref<1x1x8xbf16, #tpu.memory_space<vmem>>, vector<1x1x8xbf16>
      %c0_21 = arith.constant 0 : index
      %c0_22 = arith.constant 0 : index
      %c0_23 = arith.constant 0 : index
      %15 = vector.load %arg3[%c0_21, %c0_22, %c0_23] : memref<1x8x32xbf16, #tpu.memory_space<vmem>>, vector<1x8x32xbf16>
      "tpu.trace_start"() <{level = 10 : i32, message = "bql,bld->bqd"}> : () -> ()
      %cst_24 = arith.constant dense<0.000000e+00> : vector<1x1x32xf32>
      %16 = tpu.matmul %14, %15, %cst_24 {dimension_numbers = #tpu.dot_dimension_numbers<[2], [1], [1], [2], [0, 0, 0, 1, 1, 2], [0], [0]>} : vector<1x1x8xbf16>, vector<1x8x32xbf16>, vector<1x1x32xf32> -> vector<1x1x32xf32>
      "tpu.trace_stop"() : () -> ()
      %c0_25 = arith.constant 0 : index
      %c0_26 = arith.constant 0 : index
      %c0_27 = arith.constant 0 : index
      %17 = vector.load %arg7[%c0_25, %c0_26, %c0_27] : memref<1x1x32xf32, #tpu.memory_space<vmem>>, vector<1x1x32xf32>
      tpu.vector_store %arg7[%c0_25, %c0_26, %c0_27], %16 {strides = array<i32>} : memref<1x1x32xf32, #tpu.memory_space<vmem>>, vector<1x1x32xf32>,
      %cst_28 = arith.constant 0.000000e+00 : f32
      %18 = vector.broadcast %cst_28 : f32 to vector<1x1x1xf32>
      %c0_29 = arith.constant 0 : index
      %c0_30 = arith.constant 0 : index
      %c0_31 = arith.constant 0 : index
      %19 = vector.load %arg8[%c0_29, %c0_30, %c0_31] : memref<1x1x1xf32, #tpu.memory_space<vmem>>, vector<1x1x1xf32>
      tpu.vector_store %arg8[%c0_29, %c0_30, %c0_31], %18 {strides = array<i32>} : memref<1x1x1xf32, #tpu.memory_space<vmem>>, vector<1x1x1xf32>,
    } else {
    }
    %c0 = arith.constant 0 : index
    %c0_1 = arith.constant 0 : index
    %c0_2 = arith.constant 0 : index
    %3 = vector.load %arg4[%c0, %c0_1, %c0_2] : memref<1x1x16xbf16, #tpu.memory_space<vmem>>, vector<1x1x16xbf16>
    %c0_3 = arith.constant 0 : index
    %c0_4 = arith.constant 0 : index
    %c0_5 = arith.constant 0 : index
    %4 = vector.load %arg5[%c0_3, %c0_4, %c0_5] : memref<1x16x32xbf16, #tpu.memory_space<vmem>>, vector<1x16x32xbf16>
    "tpu.trace_start"() <{level = 10 : i32, message = "bql,bld->bqd"}> : () -> ()
    %cst = arith.constant dense<0.000000e+00> : vector<1x1x32xf32>
    %5 = tpu.matmul %3, %4, %cst {dimension_numbers = #tpu.dot_dimension_numbers<[2], [1], [1], [2], [0, 0, 0, 1, 1, 2], [0], [0]>} : vector<1x1x16xbf16>, vector<1x16x32xbf16>, vector<1x1x32xf32> -> vector<1x1x32xf32>
    "tpu.trace_stop"() : () -> ()
    %c0_6 = arith.constant 0 : index
    %c0_7 = arith.constant 0 : index
    %c0_8 = arith.constant 0 : index
    %6 = vector.load %arg8[%c0_6, %c0_7, %c0_8] : memref<1x1x1xf32, #tpu.memory_space<vmem>>, vector<1x1x1xf32>
    %c0_9 = arith.constant 0 : index
    %c0_10 = arith.constant 0 : index
    %c0_11 = arith.constant 0 : index
    %7 = vector.load %arg7[%c0_9, %c0_10, %c0_11] : memref<1x1x32xf32, #tpu.memory_space<vmem>>, vector<1x1x32xf32>
    "tpu.trace_start"() <{level = 10 : i32, message = "bqd,bkd->bqk"}> : () -> ()
    %cst_12 = arith.constant dense<0.000000e+00> : vector<1x1x1xf32>
    %8 = tpu.matmul %7, %5, %cst_12 {dimension_numbers = #tpu.dot_dimension_numbers<[2], [2], [1], [1], [0, 0, 0, 1, 1, 1], [0], [0]>} : vector<1x1x32xf32>, vector<1x1x32xf32>, vector<1x1x1xf32> -> vector<1x1x1xf32>
    "tpu.trace_stop"() : () -> ()
    %9 = arith.addf %6, %8 : vector<1x1x1xf32>
    %c0_13 = arith.constant 0 : index
    %c0_14 = arith.constant 0 : index
    %c0_15 = arith.constant 0 : index
    %10 = vector.load %arg8[%c0_13, %c0_14, %c0_15] : memref<1x1x1xf32, #tpu.memory_space<vmem>>, vector<1x1x1xf32>
    tpu.vector_store %arg8[%c0_13, %c0_14, %c0_15], %9 {strides = array<i32>} : memref<1x1x1xf32, #tpu.memory_space<vmem>>, vector<1x1x1xf32>,
    %c0_i32_16 = arith.constant 0 : i32
    %11 = arith.cmpi eq, %arg1, %c0_i32_16 : i32
    %12 = arith.extui %11 : i1 to i32
    %c0_i32_17 = arith.constant 0 : i32
    %13 = arith.cmpi ne, %12, %c0_i32_17 : i32
    scf.if %13 {
      %c0_18 = arith.constant 0 : index
      %c0_19 = arith.constant 0 : index
      %c0_20 = arith.constant 0 : index
      %14 = vector.load %arg8[%c0_18, %c0_19, %c0_20] : memref<1x1x1xf32, #tpu.memory_space<vmem>>, vector<1x1x1xf32>
      %c0_21 = arith.constant 0 : index
      %c0_22 = arith.constant 0 : index
      %c0_23 = arith.constant 0 : index
      %15 = vector.load %arg6[%c0_21, %c0_22, %c0_23] : memref<1x1x1xf32, #tpu.memory_space<vmem>>, vector<1x1x1xf32>
      tpu.vector_store %arg6[%c0_21, %c0_22, %c0_23], %14 {strides = array<i32>} : memref<1x1x1xf32, #tpu.memory_space<vmem>>, vector<1x1x1xf32>,
    } else {
    }
    return
  }
  func.func @transform_0(%arg0: i32, %arg1: i32) -> (i32, i32, i32) {
    %c0_i32 = arith.constant 0 : i32
    %c0_i32_0 = arith.constant 0 : i32
    %c0_i32_1 = arith.constant 0 : i32
    return %arg0, %c0_i32, %c0_i32_0 : i32, i32, i32
  }
  func.func @transform_1(%arg0: i32, %arg1: i32) -> (i32, i32, i32) {
    %c0_i32 = arith.constant 0 : i32
    %c0_i32_0 = arith.constant 0 : i32
    %c0_i32_1 = arith.constant 0 : i32
    return %arg0, %c0_i32, %c0_i32_0 : i32, i32, i32
  }
  func.func @transform_2(%arg0: i32, %arg1: i32) -> (i32, i32, i32) {
    %c0_i32 = arith.constant 0 : i32
    %c0_i32_0 = arith.constant 0 : i32
    return %arg0, %c0_i32, %arg1 : i32, i32, i32
  }
  func.func @transform_3(%arg0: i32, %arg1: i32) -> (i32, i32, i32) {
    %c0_i32 = arith.constant 0 : i32
    %c0_i32_0 = arith.constant 0 : i32
    return %arg0, %arg1, %c0_i32 : i32, i32, i32
  }
  func.func @transform_4(%arg0: i32, %arg1: i32) -> (i32, i32, i32) {
    %c0_i32 = arith.constant 0 : i32
    %c0_i32_0 = arith.constant 0 : i32
    %c0_i32_1 = arith.constant 0 : i32
    return %arg0, %c0_i32, %c0_i32_0 : i32, i32, i32
  }
}

</mosaic_0001>

<bundles_post_ra>
// kernel: tpu_custom_call.1
= control target key start
LH: loop header
LB: loop body
LE: loop exit
PB: predicated region body
PF: predicated region fallthrough
CT: control target
= control target key end

     0   :  { %9 = vsyncpa [#allocation5], 0  ;;  %s874_s0 = inlined_call_operand.vmem [shape: bf16[2,1,8], index: 0, kind: input, shape index: {}]   ;;  %s875_s1 = inlined_call_operand.hbm [shape: bf16[2,8,32], index: 1, kind: input, shape index: {}]   ;;  %s876_s2 = inlined_call_operand.vmem [shape: bf16[2,1,16], index: 2, kind: input, shape index: {}]   ;;  %s877_s3 = inlined_call_operand.vmem [shape: bf16[2,16,32], index: 3, kind: input, shape index: {}]   ;;  %s878_s4 = inlined_call_operand.vmem [shape: f32[2,1,1], index: 4, kind: output, shape index: {}]  }
   0x1   :  { %11 = vsyncpa [#allocation5 + $0x1], 0  ;;  %s731_s15 = smov 0   ;;  %s733_s16 = smov 0  }
   0x2   :  { %s735_s17 = smov 0   ;;  %s737_s18 = smov 0  }
   0x3   :  { %s739_s19 = smov 0   ;;  %s741_s20 = smov 0  }
   0x4 LB: > { %s531_s21 = sadd.s32 4294967295, %s701_s20   ;;  %s29_s22 = sadd.s32 1, %s697_s19  ;;  %s701_s20 = sphi %s741_s20, %s17_s20   ;;  %s697_s19 = sphi %s739_s19, %s888_s19   ;;  %s693_s18 = sphi %s737_s18, %s887_s18   ;;  %s689_s17 = sphi %s735_s17, %s886_s17   ;;  %s685_s16 = sphi %s733_s16, %s885_s16   ;;  %s681_s15 = sphi %s731_s15, %s884_s15  }
   0x5   : > { %p31_p0 = scmp.ge.s32.totalorder %s29_s22, 2  ;;  %s62_s23 = sadd.s32 1, %s689_s17 }
   0x6   : > { %p69_p1 = scmp.ne.s32.totalorder %s689_s17, %s685_s16  ;;  %p70_p2 = scmp.eq.s32.totalorder %s701_s20, 0 }
   0x7   : > { %s890_s22 = smov (%p31_p0, %s29_s22), 0  ;;  %p75_p4 = scmp.ne.s32.totalorder %s685_s16, %s681_s15 }
   0x8   : > { %p767_p3 = por %p70_p2, %p69_p1  ;;  %s59_s25 = ssub.s32 %s697_s19, %s890_s22 }
   0x9   : > { %p76_p5 = scmp.eq.s32.totalorder %s531_s21, 0  ;;  %p60_p6 = scmp.eq.s32.totalorder %s59_s25, 0 }
   0xa   : > { %p569_p8 = scmp.lt.s32.totalorder %s701_s20, 2  ;;  %s187_s28 = sand.u32 1, %s689_s17  }
   0xb   : > { %p774_p7 = por %p76_p5, %p75_p4  ;;  %s536_s29 = sshll.u32 %s697_s19, 6 }
   0xc   : > { %s780_s27 = scalar_select %p60_p6, %s689_s17, %s62_s23  }
   0xd   : > { %s535_s30 = sshll.u32 %s187_s28, 2  ;;  %s787_s7 = scalar_lea.hbm %s875_s1, %s536_s29 }
   0xe   : > { %s191_s8 = scalar_lea.vmem [#allocation4], %s535_s30  ;;  %p791_p9 = pnand %p569_p8, %p767_p3 }
   0xf   : > { %s198_s9 = sshll.u32 %s191_s8, 4  ;;  %s188_s11 = scalar_lea.sflag [#allocation5], %s187_s28  ;;  %s795_s9 = int_to_ptr.vmem [resolvable:$true] %s198_s9 }
  0x10   : > { %s621_s12 = scalar_lea.hbm %s787_s7, 64  ;;  %p623_p13 = pneg %p791_p9 }
  0x11   : > { %p622_p12 = scmp.ne.s32.totalorder %s787_s7, %s621_s12  ;;  %s626_s15 = scalar_lea.hbm %s875_s1, 128 }
  0x12   : > { %p627_p2 = scmp.lt.u32.totalorder %s787_s7, %s875_s1  ;;  %p628_p3 = scmp.lt.u32.totalorder %s626_s15, %s621_s12 }
  0x13   : > { %p624_p0 = pnand %p623_p13, %p622_p12  ;;  %p630_p5 = scmp.lt.u32.totalorder %s621_s12, %s787_s7 }
  0x14   : > { %p629_p4 = por %p628_p3, %p627_p2 }
  0x15   : > { %p625_p1 = pneg %p624_p0 }
  0x16   : > { %p631_p6 = por %p630_p5, %p629_p4 }
  0x18   : > { %p632_p8 = pnand %p631_p6, %p625_p1 }
  0x1a   : > { %635 = shalt.err (!%p632_p8)
}
  0x1b   : > { %s636_s24 = scalar_lea.vmem %s795_s9, 64  ;;  %s703_s25 = smov [#allocation4]  }
  0x1c   : > { %p637_p12 = scmp.ne.s32.totalorder %s795_s9, %s636_s24  ;;  %s641_s28 = sshll.u32 %s703_s25, 4  ;;  %s642_s28 = int_to_ptr.vmem [resolvable:$false] %s641_s28 }
  0x1d   : > { %s643_s29 = scalar_lea.vmem %s642_s28, 128  ;;  %p644_p11 = scmp.lt.s32.totalorder %s795_s9, %s642_s28 }
  0x1e   : > { %p639_p0 = pnand %p637_p12, %p623_p13  ;;  %p645_p2 = scmp.lt.s32.totalorder %s643_s29, %s636_s24 }
  0x20   : > { %p640_p10 = pneg %p639_p0  ;;  %p646_p3 = por %p645_p2, %p644_p11 }
  0x22   : > { %p647_p4 = pnand %p646_p3, %p640_p10 }
  0x24   : > { %650 = shalt.err (!%p647_p4)
}
  0x25   : > { %568 = dma.hbm_to_vmem [thread:$0]  (!%p791_p9), %s787_s7, 64, %s795_s9, %s188_s11  }
  0x26   : > { %p882_p1 = scmp.lt.s32.totalorder %s701_s20, 3  ;;  %p883_p5 = scmp.ge.s32.totalorder %s701_s20, 1 }
  0x28   : > { %p226_p13 = pnand %p883_p5, %p882_p1 }
  0x29   : > { %s231_s30 = sand.u32 (!%p226_p13), 1, %s685_s16  }
  0x2a   : > { %229 = sbr.rel (%p226_p13) target bundleno = 432 (0x1b0), region = 36  ;;  %s538_s5 = sshll.u32 (!%p226_p13), %s231_s30, 2 }
  0x2b   : > { %s232_s6 = scalar_lea.sflag (!%p226_p13), [#allocation5], %s231_s30  ;;  %s235_s8 = scalar_lea.vmem (!%p226_p13), [#allocation4], %s538_s5 }
  0x31   : > { %676 = dma.done.wait (%p774_p7), %s232_s6, 64  }
  0x32   : > { %678 = vsyncadd (%p774_p7), %s232_s6, 4294967232  ;;  %vm355_vm0 = vcmask 0   ;;  %p276_p10 = scmp.lt.s32.totalorder %s693_s18, 1  ;;  %v704_v0 = vmov 0.0   ;;  %vm705_vm1 = vmmov 0   ;;  %vm309_vm2 = vcmask 1043456  }
  0x33   : > { %551 = vmatprep.subr.bf16.mxu0 %v704_v0  ;;  %356 = vst.msk [vmem:[#allocation3] sm:$0x1] %vm355_vm0, %v704_v0  ;;  %553 = vmatprep.mubr.msk.bf16.mxu0 %vm705_vm1, %v704_v0  ;;  %v304_v1 = vld [vmem:[%s235_s8] sm:$0xf]  ;;  %vm305_vm3 = vcmask 64512   ;;  %vm366_vm4 = vcmask 130048  }
  0x34   : > { %s892_s18 = smov (!%p276_p10, %s693_s18), 1  ;;  %557 = vmatprep.subr.bf16.mxu1 %v704_v0  ;;  %559 = vmatprep.mubr.msk.bf16.mxu1 %vm705_vm1, %v704_v0  ;;  %v311_v2 = vsel %vm309_vm2, %v304_v1, 0  ;;  %vm353_vm5 = vcmask 253952  }
  0x35   : > { %s546_s26 = sshll.u32 %s892_s18, 3  ;;  %s278_s10 = scalar_lea.vmem %s874_s0, %s892_s18  ;;  %552 = vmatpush3.bf16.msra.mxu0 %v311_v2 }
  0x36   : > { %s293_s13 = scalar_lea.vmem %s877_s3, %s546_s26  ;;  %s284_s21 = scalar_lea.vmem %s876_s2, %s892_s18  ;;  %v303_v4 = vld [vmem:[%s278_s10] sm:$0x1] }
  0x37   : > { %v620_v3 = vld [vmem:[%s293_s13] sm:$0xff]   ;;  %s297_s25 = scalar_lea.vmem %s878_s4, %s892_s18 }
  0x38   : > { %558 = vmatpush3.bf16.msra.mxu1 %v620_v3  ;;  %v357_v5 = vld [vmem:[%s284_s21] sm:$0x1]  ;;  %554 = vmatmul.mubr.msk.bf16.vlgmr.msra.gmra.mrb[0].mxu0 %vm305_vm3, %v303_v4 }
  0x3a   : > { %v410_v17 = vld [vmem:[#allocation3] sm:$0x1] }
  0x3b   : > { %560 = vmatmul.mubr.msk.bf16.vlgmr.msra.gmra.mrb[0].mxu1 %vm366_vm4, %v357_v5 }
 0x10b   : > { %v347_v6 = vpop.f32.mrb[0].mxu0 }
 0x10c   : > { %v555_v7 = vpop.f32.mrb[1].mxu0  ;;  %354 = vst.msk [vmem:[#allocation2] sm:$0x1] %vm353_vm5, %v347_v6 }
 0x10d   : > { %v350_v9 = vpop.f32.mrb[2].mxu0 }
 0x10e   : > { %v404_v8 = vpop.f32.mrb[0].mxu1  ;;  %v556_v11 = vpop.f32.mrb[3].mxu0 }
 0x10f   : > { %v561_v10 = vpop.f32.mrb[1].mxu1 }
 0x110   : > { %v407_v12 = vpop.f32.mrb[2].mxu1 }
 0x111   : > { %v562_v13 = vpop.f32.mrb[3].mxu1 }
 0x113   : > { %v411_v14 = vld [vmem:[#allocation2] sm:$0x1] }
 0x114   : > { %v412_v15 = vmul.f32 %v411_v14, %v404_v8 }
 0x116   : > { %v414_v16 = vsel %vm353_vm5, %v412_v15, 0.0 }
 0x117   : > { %415 = vadd.xlane.f32.xlu0 %v414_v16 }
 0x1a4   : > { %v416_v18 = vpop.xlane.xlu0 %415 }
 0x1a5   : > { %v417_v19 = vadd.f32 %v416_v18, %v410_v17 }
 0x1a7   : > { %419 = vst.msk [vmem:[#allocation3] sm:$0x1] %vm355_vm0, %v417_v19 }
 0x1ae   : > { %v423_v20 = vld [vmem:[#allocation3] sm:$0x1] }
 0x1af   : > { %424 = vst.msk [vmem:[%s297_s25] sm:$0x1] %vm355_vm0, %v423_v20 }
 0x1b0 PF: > { %s17_s20 = sadd.s32 1, %s701_s20   ;;  %s884_s15 = smov %s685_s16 }
 0x1b1   : > { %p14_p7 = scmp.ge.s32.totalorder %s17_s20, 4   ;;  %s885_s16 = smov %s689_s17 }
 0x1b2   : > { %s886_s17 = smov %s780_s27  ;;  %s887_s18 = smov %s697_s19 }
 0x1b3   : > { %s888_s19 = smov %s890_s22  ;;  %16 = sbr.rel (!%p14_p7) target bundleno = 4 (0x4), region = 93 }
 0x1ba   :  { %442 = vsyncpa [#allocation5], 1 }
 0x1bb   :  { %444 = vsyncpa [#allocation5 + $0x1], 1 }

</bundles_post_ra>
